<compile_context>
chip_gen: v7x
topology: tpu7x:2x2x1
jax: 0.10.0
libtpu: 0.0.40
codegen_flags: <defaults>
</compile_context>

<pallas_src>
import jax
import jax.numpy as jnp
from jax.experimental import pallas as pl
from jax.experimental.pallas import tpu as pltpu

EPS = 1e-5  # torch.nn.LayerNorm default


# --------------------------------------------------------------------------
# Kernels
# --------------------------------------------------------------------------
def _prenorm_kernel_fullh(x_ref, gamma_ref, w_ref, b_ref, o_ref):
    # x_ref: (TM, D), gamma_ref: (1, D), w_ref: (D, H), b_ref: (1, H),
    # o_ref: (TM, H).  Norm + full-width matmul in one grid step.
    x = x_ref[...].astype(jnp.float32)
    mean = jnp.mean(x, axis=-1, keepdims=True)
    xc = x - mean
    var = jnp.mean(xc * xc, axis=-1, keepdims=True)      # two-pass, PyTorch-style
    inv = jax.lax.rsqrt(var + EPS)
    y = (xc * inv) * gamma_ref[...].astype(jnp.float32)
    out = jnp.dot(y.astype(w_ref.dtype), w_ref[...],
                  preferred_element_type=jnp.float32)
    out = out + b_ref[...].astype(jnp.float32)            # LN beta folded in
    o_ref[...] = out.astype(o_ref.dtype)


def _prenorm_kernel_split(x_ref, gamma_ref, w_ref, b_ref, o_ref, y_ref):
    # Grid = (num_m, num_n), n inner.  LayerNorm runs ONCE per row tile and is
    # cached in VMEM scratch y_ref (TM, D); each n-step only does the matmul.
    @pl.when(pl.program_id(1) == 0)
    def _():
        x = x_ref[...].astype(jnp.float32)
        mean = jnp.mean(x, axis=-1, keepdims=True)
        xc = x - mean
        var = jnp.mean(xc * xc, axis=-1, keepdims=True)
        inv = jax.lax.rsqrt(var + EPS)
        y = (xc * inv) * gamma_ref[...].astype(jnp.float32)
        y_ref[...] = y.astype(y_ref.dtype)

    out = jnp.dot(y_ref[...], w_ref[...], preferred_element_type=jnp.float32)
    out = out + b_ref[...].astype(jnp.float32)
    o_ref[...] = out.astype(o_ref.dtype)


# --------------------------------------------------------------------------
# Tile / VMEM sizing helpers
# --------------------------------------------------------------------------
def _vmem_cap_bytes():
    try:
        cap = int(pltpu.get_tpu_info().vmem_capacity_bytes)
    except Exception:
        cap = 64 << 20          # conservative (v7x-sized) fallback
    return (cap * 3) // 4       # headroom for compiler-internal scratch


def _vmem_need_bytes(tm, tn, D, xb, wb, ob, split):
    need = 2 * tm * D * xb                    # double-buffered x tiles
    need += 2 * D * tn * wb                   # double-buffered weight tiles
    need += 2 * tm * tn * ob                  # double-buffered output tiles
    need += 2 * (D * xb + tn * 4)             # gamma / bias params
    need += 3 * tm * D * 4 + tm * tn * 4      # in-kernel f32 temporaries
    if split:
        need += tm * D * wb                   # normalized-row scratch
    return need


def _proper_divisors_mult(n, mult):
    return [t for t in range(n - 1, 0, -1) if n % t == 0 and t % mult == 0]


def _choose_tiles(M, D, H, xb, wb, ob, cap):
    m8 = max(8, 8 * pl.cdiv(M, 8))
    tm_cands = [t for t in (1024, 512, 256, 128, 64, 32, 16, 8) if t <= m8]
    if not tm_cands:
        tm_cands = [8]
    # 1) Prefer full-H output tiles: x streamed once, norm computed once/row.
    for tm in tm_cands:
        if _vmem_need_bytes(tm, H, D, xb, wb, ob, split=False) <= cap:
            return tm, H, False
    # 2) Split H into lane-dense (multiple-of-128) tiles, largest first, with
    #    the normalized rows cached in scratch.
    tn_cands = _proper_divisors_mult(H, 128)
    for tm in tm_cands:
        for tn in tn_cands:
            if _vmem_need_bytes(tm, tn, D, xb, wb, ob, split=True) <= cap:
                return tm, tn, True
    # 3) Fallback: smallest tiles available.
    tm = tm_cands[-1]
    tn = tn_cands[-1] if tn_cands else H
    return tm, tn, (tn != H)


# --------------------------------------------------------------------------
# Wrapper
# --------------------------------------------------------------------------
def prenorm_linear(x, gamma, beta, w, b, *, tm=None, tn=None):
    """x: (B, S, D) -> (B, S, H).  Fused LayerNorm(D) then x @ w + b."""
    B, S, D = x.shape
    H = w.shape[1]
    M = B * S

    xb = x.dtype.itemsize
    wb = w.dtype.itemsize
    ob = x.dtype.itemsize
    cap = _vmem_cap_bytes()

    auto_tm, auto_tn, _ = _choose_tiles(M, D, H, xb, wb, ob, cap)
    if tm is None:
        tm = auto_tm
    else:
        tm = max(8, (int(tm) // 8) * 8)
    if tn is None:
        tn = auto_tn
    else:
        tn = int(tn)
        if H % tn != 0 or (tn != H and tn % 128 != 0):
            tn = auto_tn
    split = tn != H

    num_m = pl.cdiv(M, tm)
    num_n = H // tn
    Mp = num_m * tm

    # Flatten rows; zero-pad the M remainder (LayerNorm of a zero row is
    # finite thanks to eps, and the padded rows are sliced off afterwards).
    x2 = x.reshape(M, D)
    if Mp != M:
        x2 = jnp.pad(x2, ((0, Mp - M), (0, 0)))
    gamma2 = gamma.reshape(1, D)
    # Fold LayerNorm beta into the Linear bias (exact):
    #   (y*gamma + beta) @ w + b  ==  (y*gamma) @ w + (beta @ w + b)
    b_eff = (jnp.dot(beta.astype(jnp.float32), w.astype(jnp.float32))
             + b.astype(jnp.float32)).reshape(1, H)

    need = _vmem_need_bytes(tm, tn, D, xb, wb, ob, split)
    vmem_limit = int(min(max(2 * need, 16 << 20), cap))

    if not split:
        grid = (num_m,)
        kernel = _prenorm_kernel_fullh
        in_specs = [
            pl.BlockSpec((tm, D), lambda i: (i, 0)),    # x rows
            pl.BlockSpec((1, D), lambda i: (0, 0)),     # gamma
            pl.BlockSpec((D, tn), lambda i: (0, 0)),    # full weight
            pl.BlockSpec((1, tn), lambda i: (0, 0)),    # fused bias
        ]
        out_specs = pl.BlockSpec((tm, tn), lambda i: (i, 0))
        scratch_shapes = []
        semantics = ("parallel",)                       # megacore shards rows
    else:
        # m outer (sharded across TCs), n inner; x block index constant over
        # the inner sweep so its DMA is skipped, norm runs once per row tile.
        grid = (num_m, num_n)
        kernel = _prenorm_kernel_split
        in_specs = [
            pl.BlockSpec((tm, D), lambda i, j: (i, 0)),   # x rows
            pl.BlockSpec((1, D), lambda i, j: (0, 0)),    # gamma
            pl.BlockSpec((D, tn), lambda i, j: (0, j)),   # weight tile
            pl.BlockSpec((1, tn), lambda i, j: (0, j)),   # fused bias tile
        ]
        out_specs = pl.BlockSpec((tm, tn), lambda i, j: (i, j))
        scratch_shapes = [pltpu.VMEM((tm, D), w.dtype)]   # normalized rows
        semantics = ("parallel", "arbitrary")

    out = pl.pallas_call(
        kernel,
        out_shape=jax.ShapeDtypeStruct((Mp, H), x.dtype),
        grid_spec=pltpu.PrefetchScalarGridSpec(
            num_scalar_prefetch=0,
            grid=grid,
            in_specs=in_specs,
            out_specs=out_specs,
            scratch_shapes=scratch_shapes,
        ),
        compiler_params=pltpu.CompilerParams(
            dimension_semantics=semantics,
            vmem_limit_bytes=vmem_limit,
        ),
    )(x2, gamma2, w, b_eff)

    if Mp != M:
        out = out[:M]
    return out.reshape(B, S, H)


# --------------------------------------------------------------------------
# Pure-JAX reference (PyTorch semantics)
# --------------------------------------------------------------------------
def prenorm_reference(x, gamma, beta, w, b):
    xf = x.astype(jnp.float32)
    mean = jnp.mean(xf, axis=-1, keepdims=True)
    var = jnp.mean((xf - mean) ** 2, axis=-1, keepdims=True)
    y = (xf - mean) * jax.lax.rsqrt(var + EPS) * gamma + beta
    out = jnp.dot(y, w.astype(jnp.float32), preferred_element_type=jnp.float32) + b
    return out.astype(x.dtype)


if __name__ == "__main__":
    key = jax.random.PRNGKey(0)
    # Small demo shapes (D, H lane-dense multiples of 128).
    B, S, D, H = 2, 64, 128, 256

    kx, kg, kb, kw, kbias = jax.random.split(key, 5)
    # Offset the input so the two-pass variance is actually exercised.
    x = jax.random.normal(kx, (B, S, D), dtype=jnp.float32) + 0.5
    gamma = jnp.ones((D,), jnp.float32) + 0.1 * jax.random.normal(kg, (D,))
    beta = 0.1 * jax.random.normal(kb, (D,))
    w = jax.random.normal(kw, (D, H), dtype=jnp.float32) / jnp.sqrt(D)
    b = 0.1 * jax.random.normal(kbias, (H,))

    ref = prenorm_reference(x, gamma, beta, w, b)

    # TODO(synk): the PyTorch module wraps an arbitrary `fn`; only the common
    # Linear(dim -> hidden) instantiation is fused here.

    # 1) auto-tiled path: tn == H, grid over rows only.
    out_full = prenorm_linear(x, gamma, beta, w, b)
    jax.block_until_ready(out_full)
    assert out_full.shape == (B, S, H)
    assert jnp.allclose(out_full, ref, atol=1e-3, rtol=1e-3), "full-H mismatch"

    # 2) forced-split path: exercises the norm-once-per-row-tile scratch kernel.
    out_split = prenorm_linear(x, gamma, beta, w, b, tm=64, tn=128)
    jax.block_until_ready(out_split)
    assert jnp.allclose(out_split, ref, atol=1e-3, rtol=1e-3), "split mismatch"

    print("KERNEL_OK")
</pallas_src>

<mosaic_0001>
module attributes {stable_mosaic.version = 11 : i64} {
  func.func @_prenorm_kernel_fullh(%arg0: i32, %arg1: memref<128x128xf32, #tpu.memory_space<vmem>>, %arg2: memref<1x128xf32, #tpu.memory_space<vmem>>, %arg3: memref<128x256xf32, #tpu.memory_space<vmem>>, %arg4: memref<1x256xf32, #tpu.memory_space<vmem>>, %arg5: memref<128x256xf32, #tpu.memory_space<vmem>>) attributes {dimension_semantics = [#tpu.dimension_semantics<parallel>], iteration_bounds = array<i64: 1>, scalar_prefetch = 0 : i64, scratch_operands = 0 : i64, tpu.core_type = #tpu.core_type<tc>, window_params = [{transform_indices = @transform_0, window_bounds = array<i64: 128, 128>}, {pipeline_mode = #tpu.pipeline_mode<synchronous>, transform_indices = @transform_1, window_bounds = array<i64: 1, 128>}, {pipeline_mode = #tpu.pipeline_mode<synchronous>, transform_indices = @transform_2, window_bounds = array<i64: 128, 256>}, {pipeline_mode = #tpu.pipeline_mode<synchronous>, transform_indices = @transform_3, window_bounds = array<i64: 1, 256>}, {transform_indices = @transform_4, window_bounds = array<i64: 128, 256>}]} {
    %c0 = arith.constant 0 : index
    %c0_0 = arith.constant 0 : index
    %0 = vector.load %arg1[%c0, %c0_0] : memref<128x128xf32, #tpu.memory_space<vmem>>, vector<128x128xf32>
    %cst = arith.constant dense<0.000000e+00> : vector<128xf32>
    %1 = vector.multi_reduction <add>, %0, %cst [1] : vector<128x128xf32> to vector<128xf32>
    %2 = vector.shape_cast %1 : vector<128xf32> to vector<128x1xf32>
    %cst_1 = arith.constant 1.280000e+02 : f32
    %3 = vector.broadcast %cst_1 : f32 to vector<128x1xf32>
    %4 = arith.divf %2, %3 : vector<128x1xf32>
    %5 = vector.broadcast %4 : vector<128x1xf32> to vector<128x128xf32>
    %6 = arith.subf %0, %5 : vector<128x128xf32>
    %7 = arith.mulf %6, %6 : vector<128x128xf32>
    %cst_2 = arith.constant dense<0.000000e+00> : vector<128xf32>
    %8 = vector.multi_reduction <add>, %7, %cst_2 [1] : vector<128x128xf32> to vector<128xf32>
    %9 = vector.shape_cast %8 : vector<128xf32> to vector<128x1xf32>
    %cst_3 = arith.constant 1.280000e+02 : f32
    %10 = vector.broadcast %cst_3 : f32 to vector<128x1xf32>
    %11 = arith.divf %9, %10 : vector<128x1xf32>
    %cst_4 = arith.constant 9.99999974E-6 : f32
    %12 = vector.broadcast %cst_4 : f32 to vector<128x1xf32>
    %13 = arith.addf %11, %12 : vector<128x1xf32>
    %14 = math.rsqrt %13 : vector<128x1xf32>
    %15 = vector.broadcast %14 : vector<128x1xf32> to vector<128x128xf32>
    %16 = arith.mulf %6, %15 : vector<128x128xf32>
    %c0_5 = arith.constant 0 : index
    %c0_6 = arith.constant 0 : index
    %17 = vector.load %arg2[%c0_5, %c0_6] : memref<1x128xf32, #tpu.memory_space<vmem>>, vector<1x128xf32>
    %18 = vector.broadcast %17 : vector<1x128xf32> to vector<128x128xf32>
    %19 = arith.mulf %16, %18 : vector<128x128xf32>
    %c0_7 = arith.constant 0 : index
    %c0_8 = arith.constant 0 : index
    %20 = vector.load %arg3[%c0_7, %c0_8] : memref<128x256xf32, #tpu.memory_space<vmem>>, vector<128x256xf32>
    %cst_9 = arith.constant dense<0.000000e+00> : vector<128x256xf32>
    %21 = tpu.matmul %19, %20, %cst_9 {dimension_numbers = #tpu.dot_dimension_numbers<[1], [0], [0], [1], [0, 0, 1, 1], [], []>} : vector<128x128xf32>, vector<128x256xf32>, vector<128x256xf32> -> vector<128x256xf32>
    %c0_10 = arith.constant 0 : index
    %c0_11 = arith.constant 0 : index
    %22 = vector.load %arg4[%c0_10, %c0_11] : memref<1x256xf32, #tpu.memory_space<vmem>>, vector<1x256xf32>
    %23 = vector.broadcast %22 : vector<1x256xf32> to vector<128x256xf32>
    %24 = arith.addf %21, %23 : vector<128x256xf32>
    %c0_12 = arith.constant 0 : index
    %c0_13 = arith.constant 0 : index
    %25 = vector.load %arg5[%c0_12, %c0_13] : memref<128x256xf32, #tpu.memory_space<vmem>>, vector<128x256xf32>
    tpu.vector_store %arg5[%c0_12, %c0_13], %24 {strides = array<i32>} : memref<128x256xf32, #tpu.memory_space<vmem>>, vector<128x256xf32>,
    return
  }
  func.func @transform_0(%arg0: i32) -> (i32, i32) {
    %c0_i32 = arith.constant 0 : i32
    %c0_i32_0 = arith.constant 0 : i32
    return %arg0, %c0_i32 : i32, i32
  }
  func.func @transform_1(%arg0: i32) -> (i32, i32) {
    %c0_i32 = arith.constant 0 : i32
    %c0_i32_0 = arith.constant 0 : i32
    %c0_i32_1 = arith.constant 0 : i32
    return %c0_i32, %c0_i32_0 : i32, i32
  }
  func.func @transform_2(%arg0: i32) -> (i32, i32) {
    %c0_i32 = arith.constant 0 : i32
    %c0_i32_0 = arith.constant 0 : i32
    %c0_i32_1 = arith.constant 0 : i32
    return %c0_i32, %c0_i32_0 : i32, i32
  }
  func.func @transform_3(%arg0: i32) -> (i32, i32) {
    %c0_i32 = arith.constant 0 : i32
    %c0_i32_0 = arith.constant 0 : i32
    %c0_i32_1 = arith.constant 0 : i32
    return %c0_i32, %c0_i32_0 : i32, i32
  }
  func.func @transform_4(%arg0: i32) -> (i32, i32) {
    %c0_i32 = arith.constant 0 : i32
    %c0_i32_0 = arith.constant 0 : i32
    return %arg0, %c0_i32 : i32, i32
  }
}

</mosaic_0001>

<bundles_post_ra>
// kernel: tpu_custom_call.1
= control target key start
LH: loop header
LB: loop body
LE: loop exit
PB: predicated region body
PF: predicated region fallthrough
CT: control target
= control target key end

     0   :  { %9 = vsyncpa [#allocation3], 0  ;;  %s973_s0 = inlined_call_operand.hbm [shape: f32[128,128], index: 0, kind: input, shape index: {}]   ;;  %s974_s1 = inlined_call_operand.vmem [shape: f32[1,128], index: 1, kind: input, shape index: {}]   ;;  %s975_s2 = inlined_call_operand.hbm [shape: f32[128,256], index: 2, kind: input, shape index: {}]   ;;  %s976_s3 = inlined_call_operand.vmem [shape: f32[1,256], index: 3, kind: input, shape index: {}]   ;;  %s977_s4 = inlined_call_operand.hbm [shape: f32[128,256], index: 4, kind: output, shape index: {}]  }
   0x1   :  { %10 = vsyncpa [#allocation6], 0 }
   0x2   :  { %11 = vsyncpa [#allocation4], 0  ;;  %s678_s15 = smov [#allocation2]   ;;  %s606_s19 = scalar_lea.hbm %s973_s0, 2048 }
   0x3   :  { %s17_s16 = sshll.u32 %s678_s15, 4  ;;  %p607_p0 = scmp.ne.s32.totalorder %s973_s0, %s606_s19  ;;  %s18_s16 = int_to_ptr.vmem [resolvable:$true] %s17_s16 }
   0x4   :  { %p610_p1 = scmp.lt.u32.totalorder %s606_s19, %s973_s0 }
   0x6   :  { %p612_p2 = pnand %p610_p1, %p607_p0 }
   0x8   :  { %615 = shalt.err (!%p612_p2)
}
   0x9   :  { %s616_s24 = scalar_lea.vmem %s18_s16, 2048  ;;  %p621_p4 = scmp.lt.s32.totalorder %s18_s16, %s18_s16 }
   0xa   :  { %p617_p3 = scmp.ne.s32.totalorder %s18_s16, %s616_s24  ;;  %p622_p5 = scmp.lt.s32.totalorder %s616_s24, %s616_s24 }
   0xc   :  { %p623_p6 = por %p622_p5, %p621_p4 }
   0xe   :  { %p624_p7 = pnand %p623_p6, %p617_p3 }
  0x10   :  { %627 = shalt.err (!%p624_p7)
}
  0x11   :  { %s679_s25 = smov 128   ;;  %s680_s26 = smov 8  }
  0x12   :  { %23 = dma.hbm_to_vmem [thread:$0]  %s973_s0, 2048, %s18_s16, [#allocation3], %s679_s25, %s679_s25, %s680_s26  }
  0x13   :  { %s681_s29 = smov [#allocation5]   ;;  %s628_s7 = scalar_lea.hbm %s975_s2, 4096 }
  0x14   :  { %s31_s30 = sshll.u32 %s681_s29, 4  ;;  %p629_p8 = scmp.ne.s32.totalorder %s975_s2, %s628_s7  ;;  %s32_s30 = int_to_ptr.vmem [resolvable:$true] %s31_s30 }
  0x15   :  { %p632_p9 = scmp.lt.u32.totalorder %s628_s7, %s975_s2 }
  0x17   :  { %p634_p10 = pnand %p632_p9, %p629_p8 }
  0x19   :  { %637 = shalt.err (!%p634_p10)
}
  0x1a   :  { %s638_s12 = scalar_lea.vmem %s32_s30, 4096  ;;  %p643_p12 = scmp.lt.s32.totalorder %s32_s30, %s32_s30 }
  0x1b   :  { %p639_p11 = scmp.ne.s32.totalorder %s32_s30, %s638_s12  ;;  %p644_p13 = scmp.lt.s32.totalorder %s638_s12, %s638_s12 }
  0x1d   :  { %p645_p0 = por %p644_p13, %p643_p12 }
  0x1f   :  { %p646_p1 = pnand %p645_p0, %p639_p11 }
  0x21   :  { %649 = shalt.err (!%p646_p1)
}
  0x22   :  { %s682_s0 = smov 256   ;;  %s683_s13 = smov 16  }
  0x23   :  { %37 = dma.hbm_to_vmem [thread:$0]  %s975_s2, 4096, %s32_s30, [#allocation6], %s682_s0, %s682_s0, %s683_s13  }
  0x24   :  { %672 = dma.done.wait [#allocation3], 2048  }
  0x25   :  { %673 = vsyncadd [#allocation3], 4294965248 }
  0x26   :  { %674 = dma.done.wait [#allocation6], 4096  }
  0x27   :  { %675 = vsyncadd [#allocation6], 4294963200  ;;  %v738_v0 = vld [vmem:[#allocation2] sm:$0xff]  ;;  %v740_v1 = vld [vmem:[#allocation2 + $0x8] sm:$0xff] }
  0x28   :  { %62 = vadd.xlane.f32.xlu0 %v738_v0  ;;  %64 = vadd.xlane.f32.xlu1 %v740_v1  ;;  %v744_v2 = vld [vmem:[#allocation2 + $0x40] sm:$0xff]  ;;  %v746_v3 = vld [vmem:[#allocation2 + $0x48] sm:$0xff]  ;;  %v750_v4 = vld [vmem:[#allocation2 + $0x10] sm:$0xff] }
  0x29   :  { %v752_v5 = vld [vmem:[#allocation2 + $0x50] sm:$0xff]  ;;  %v756_v6 = vld [vmem:[#allocation2 + $0x18] sm:$0xff]  ;;  %v762_v8 = vld [vmem:[#allocation2 + $0x20] sm:$0xff] }
  0x2a   :  { %v758_v7 = vld [vmem:[#allocation2 + $0x58] sm:$0xff]  ;;  %v764_v9 = vld [vmem:[#allocation2 + $0x60] sm:$0xff]  ;;  %v768_v10 = vld [vmem:[#allocation2 + $0x28] sm:$0xff] }
  0x2b   :  { %v770_v11 = vld [vmem:[#allocation2 + $0x68] sm:$0xff]  ;;  %v774_v12 = vld [vmem:[#allocation2 + $0x30] sm:$0xff]  ;;  %v780_v14 = vld [vmem:[#allocation2 + $0x38] sm:$0xff] }
  0x2c   :  { %78 = vadd.xlane.f32.xlu0 %v744_v2  ;;  %80 = vadd.xlane.f32.xlu1 %v746_v3  ;;  %v776_v13 = vld [vmem:[#allocation2 + $0x70] sm:$0xff]  ;;  %v782_v15 = vld [vmem:[#allocation2 + $0x78] sm:$0xff]  ;;  %v263_v16 = vld [vmem:[#allocation5 + $0x8] sm:$0xff] }
  0x2d   :  { %v265_v17 = vld [vmem:[#allocation5 + $0x18] sm:$0xff]  ;;  %v262_v18 = vld [vmem:[#allocation5] sm:$0xff]  ;;  %v264_v20 = vld [vmem:[#allocation5 + $0x10] sm:$0xff] }
  0x2e   :  { %v518_v19 = vpack.c.bf16 %v265_v17, %v263_v16  ;;  %v267_v21 = vld [vmem:[#allocation5 + $0x28] sm:$0xff]  ;;  %v269_v22 = vld [vmem:[#allocation5 + $0x38] sm:$0xff]  ;;  %v520_v23 = vpack.c.bf16 %v264_v20, %v262_v18  ;;  %v266_v25 = vld [vmem:[#allocation5 + $0x20] sm:$0xff] }
  0x2f   :  { %v522_v24 = vpack.c.bf16 %v269_v22, %v267_v21  ;;  %v268_v26 = vld [vmem:[#allocation5 + $0x30] sm:$0xff]  ;;  %v271_v27 = vld [vmem:[#allocation5 + $0x48] sm:$0xff]  ;;  %v273_v28 = vld [vmem:[#allocation5 + $0x58] sm:$0xff] }
  0x30   :  { %66 = vadd.xlane.f32.xlu0 %v750_v4  ;;  %82 = vadd.xlane.f32.xlu1 %v752_v5  ;;  %v524_v29 = vpack.c.bf16 %v268_v26, %v266_v25  ;;  %v526_v30 = vpack.c.bf16 %v273_v28, %v271_v27  ;;  %v270_v31 = vld [vmem:[#allocation5 + $0x40] sm:$0xff]  ;;  %v272_v32 = vld [vmem:[#allocation5 + $0x50] sm:$0xff]  ;;  %v275_v33 = vld [vmem:[#allocation5 + $0x68] sm:$0xff] }
  0x31   :  { %519 = vmatprep.subr.bf16.mxu0 %v518_v19  ;;  %550 = vmatprep.subr.bf16.mxu1 %v518_v19  ;;  %v277_v34 = vld [vmem:[#allocation5 + $0x78] sm:$0xff]  ;;  %v528_v35 = vpack.c.bf16 %v272_v32, %v270_v31  ;;  %v276_v19 = vld [vmem:[#allocation5 + $0x70] sm:$0xff]  ;;  %v279_v27 = vld [vmem:[#allocation5 + $0x88] sm:$0xff] }
  0x32   :  { %521 = vmatpush1.bf16.msra.mxu0 %v520_v23  ;;  %558 = vmatpush1.bf16.msra.mxu1 %v520_v23  ;;  %v530_v36 = vpack.c.bf16 %v277_v34, %v275_v33  ;;  %v281_v28 = vld [vmem:[#allocation5 + $0x98] sm:$0xff]  ;;  %v278_v31 = vld [vmem:[#allocation5 + $0x80] sm:$0xff]  ;;  %v280_v32 = vld [vmem:[#allocation5 + $0x90] sm:$0xff] }
  0x33   :  { %523 = vmatprep.subr.bf16.mxu0 %v522_v24  ;;  %551 = vmatprep.subr.bf16.mxu1 %v522_v24 }
  0x34   :  { %68 = vadd.xlane.f32.xlu0 %v756_v6  ;;  %84 = vadd.xlane.f32.xlu1 %v758_v7 }
  0x36   :  { %525 = vmatpush1.bf16.msra.mxu0 %v524_v29  ;;  %559 = vmatpush1.bf16.msra.mxu1 %v524_v29  ;;  %v534_v29 = vpack.c.bf16 %v281_v28, %v279_v27 }
  0x37   :  { %527 = vmatprep.subr.bf16.mxu0 %v526_v30  ;;  %552 = vmatprep.subr.bf16.mxu1 %v526_v30 }
  0x38   :  { %70 = vadd.xlane.f32.xlu0 %v762_v8  ;;  %86 = vadd.xlane.f32.xlu1 %v764_v9 }
  0x3a   :  { %529 = vmatpush1.bf16.msra.mxu0 %v528_v35  ;;  %560 = vmatpush1.bf16.msra.mxu1 %v528_v35  ;;  %v536_v35 = vpack.c.bf16 %v280_v32, %v278_v31 }
  0x3b   :  { %531 = vmatprep.subr.bf16.mxu0 %v530_v36  ;;  %553 = vmatprep.subr.bf16.mxu1 %v530_v36 }
  0x3c   :  { %72 = vadd.xlane.f32.xlu0 %v768_v10  ;;  %88 = vadd.xlane.f32.xlu1 %v770_v11 }
  0x40   :  { %74 = vadd.xlane.f32.xlu0 %v774_v12  ;;  %90 = vadd.xlane.f32.xlu1 %v776_v13 }
  0x44   :  { %76 = vadd.xlane.f32.xlu0 %v780_v14  ;;  %92 = vadd.xlane.f32.xlu1 %v782_v15 }
  0xb5   :  { %v63_v37 = vpop.xlane.xlu0 %62  ;;  %v65_v38 = vpop.xlane.xlu1 %64 }
  0xb6   :  { %v95_v39 = vmul.f32 0.0078125, %v63_v37  ;;  %v96_v40 = vmul.f32 0.0078125, %v65_v38 }
  0xb8   :  { %v787_v41 = vsub.f32 %v738_v0, %v95_v39  ;;  %v790_v42 = vsub.f32 %v740_v1, %v96_v40  ;;  %v285_v39 = vld [vmem:[#allocation5 + $0xb8] sm:$0xff] }
  0xb9   :  { %v79_v43 = vpop.xlane.xlu0 %78  ;;  %v81_v44 = vpop.xlane.xlu1 %80 }
  0xba   :  { %v103_v45 = vmul.f32 0.0078125, %v79_v43  ;;  %v127_v46 = vmul.f32 %v787_v41, %v787_v41  ;;  %v104_v47 = vmul.f32 0.0078125, %v81_v44  ;;  %v128_v50 = vmul.f32 %v790_v42, %v790_v42 }
  0xbc   :  { %v795_v48 = vsub.f32 %v744_v2, %v103_v45  ;;  %143 = vadd.xlane.f32.xlu0 %v127_v46  ;;  %v798_v49 = vsub.f32 %v746_v3, %v104_v47  ;;  %v282_v45 = vld [vmem:[#allocation5 + $0xa0] sm:$0xff]  ;;  %v284_v46 = vld [vmem:[#allocation5 + $0xb0] sm:$0xff] }
  0xbd   :  { %v67_v51 = vpop.xlane.xlu0 %66  ;;  %v83_v52 = vpop.xlane.xlu1 %82 }
  0xbe   :  { %v97_v53 = vmul.f32 0.0078125, %v67_v51  ;;  %v135_v54 = vmul.f32 %v795_v48, %v795_v48  ;;  %v105_v55 = vmul.f32 0.0078125, %v83_v52  ;;  %v136_v58 = vmul.f32 %v798_v49, %v798_v49 }
  0xbf   :  { %v540_v51 = vpack.c.bf16 %v284_v46, %v282_v45 }
  0xc0   :  { %v805_v56 = vsub.f32 %v750_v4, %v97_v53  ;;  %145 = vadd.xlane.f32.xlu0 %v128_v50  ;;  %159 = vadd.xlane.f32.xlu1 %v135_v54  ;;  %v808_v57 = vsub.f32 %v752_v5, %v105_v55  ;;  %v287_v55 = vld [vmem:[#allocation5 + $0xc8] sm:$0xff] }
  0xc1   :  { %v69_v59 = vpop.xlane.xlu0 %68  ;;  %v85_v60 = vpop.xlane.xlu1 %84 }
  0xc2   :  { %v98_v61 = vmul.f32 0.0078125, %v69_v59  ;;  %v129_v62 = vmul.f32 %v805_v56, %v805_v56  ;;  %v106_v63 = vmul.f32 0.0078125, %v85_v60  ;;  %v137_v2 = vmul.f32 %v808_v57, %v808_v57 }
  0xc4   :  { %v815_v0 = vsub.f32 %v756_v6, %v98_v61  ;;  %161 = vadd.xlane.f32.xlu1 %v136_v58  ;;  %147 = vadd.xlane.f32.xlu0 %v129_v62  ;;  %v818_v1 = vsub.f32 %v758_v7, %v106_v63  ;;  %v274_v6 = vld [vmem:[#allocation5 + $0x60] sm:$0xff]  ;;  %v288_v62 = vld [vmem:[#allocation5 + $0xd0] sm:$0xff] }
  0xc5   :  { %v71_v3 = vpop.xlane.xlu0 %70  ;;  %v87_v4 = vpop.xlane.xlu1 %86  ;;  %v532_v21 = vpack.c.bf16 %v276_v19, %v274_v6  ;;  %v286_v61 = vld [vmem:[#allocation5 + $0xc0] sm:$0xff] }
  0xc6   :  { %v99_v5 = vmul.f32 0.0078125, %v71_v3  ;;  %v130_v16 = vmul.f32 %v815_v0, %v815_v0  ;;  %v107_v17 = vmul.f32 0.0078125, %v87_v4  ;;  %v138_v18 = vmul.f32 %v818_v1, %v818_v1  ;;  %v291_v3 = vld [vmem:[#allocation5 + $0xe8] sm:$0xff]  ;;  %v293_v4 = vld [vmem:[#allocation5 + $0xf8] sm:$0xff] }
  0xc7   :  { %533 = vmatpush1.bf16.msra.mxu0 %v532_v21  ;;  %561 = vmatpush1.bf16.msra.mxu1 %v532_v21  ;;  %v544_v63 = vpack.c.bf16 %v288_v62, %v286_v61 }
  0xc8   :  { %v827_v20 = vsub.f32 %v762_v8, %v99_v5  ;;  %163 = vadd.xlane.f32.xlu1 %v137_v2  ;;  %149 = vadd.xlane.f32.xlu0 %v130_v16  ;;  %v830_v7 = vsub.f32 %v764_v9, %v107_v17  ;;  %v290_v5 = vld [vmem:[#allocation5 + $0xe0] sm:$0xff]  ;;  %v292_v16 = vld [vmem:[#allocation5 + $0xf0] sm:$0xff] }
  0xc9   :  { %v73_v22 = vpop.xlane.xlu0 %72  ;;  %v89_v23 = vpop.xlane.xlu1 %88  ;;  %535 = vmatprep.subr.bf16.mxu0 %v534_v29  ;;  %554 = vmatprep.subr.bf16.mxu1 %v534_v29  ;;  %v548_v17 = vpack.c.bf16 %v292_v16, %v290_v5 }
  0xca   :  { %v100_v24 = vmul.f32 0.0078125, %v73_v22  ;;  %v131_v25 = vmul.f32 %v827_v20, %v827_v20  ;;  %v108_v26 = vmul.f32 0.0078125, %v89_v23  ;;  %v139_v30 = vmul.f32 %v830_v7, %v830_v7 }
  0xcb   :  { %537 = vmatpush1.bf16.msra.mxu0 %v536_v35  ;;  %562 = vmatpush1.bf16.msra.mxu1 %v536_v35 }
  0xcc   :  { %v835_v8 = vsub.f32 %v768_v10, %v100_v24  ;;  %165 = vadd.xlane.f32.xlu1 %v138_v18  ;;  %151 = vadd.xlane.f32.xlu0 %v131_v25  ;;  %v838_v9 = vsub.f32 %v770_v11, %v108_v26  ;;  %v283_v11 = vld [vmem:[#allocation5 + $0xa8] sm:$0xff]  ;;  %v684_v18 = vmov 0.0  }
  0xcd   :  { %v75_v33 = vpop.xlane.xlu0 %74  ;;  %v91_v34 = vpop.xlane.xlu1 %90  ;;  %v538_v44 = vpack.c.bf16 %v285_v39, %v283_v11  ;;  %370 = vmatprep.mubr.f32.mxu0 %v684_v18  ;;  %418 = vmatprep.mubr.f32.mxu1 %v684_v18  ;;  %v871_v39 = vld [vmem:[%s974_s1] ss:$0 sm:$0xff] }
  0xce   :  { %v101_v36 = vmul.f32 0.0078125, %v75_v33  ;;  %v132_v10 = vmul.f32 %v835_v8, %v835_v8  ;;  %v109_v37 = vmul.f32 0.0078125, %v91_v34  ;;  %v140_v38 = vmul.f32 %v838_v9, %v838_v9 }
  0xcf   :  { %539 = vmatprep.subr.bf16.mxu0 %v538_v44  ;;  %555 = vmatprep.subr.bf16.mxu1 %v538_v44 }
  0xd0   :  { %v847_v40 = vsub.f32 %v774_v12, %v101_v36  ;;  %167 = vadd.xlane.f32.xlu1 %v139_v30  ;;  %153 = vadd.xlane.f32.xlu0 %v132_v10  ;;  %v850_v43 = vsub.f32 %v776_v13, %v109_v37  ;;  %v289_v13 = vld [vmem:[#allocation5 + $0xd8] sm:$0xff] }
  0xd1   :  { %v77_v47 = vpop.xlane.xlu0 %76  ;;  %v93_v50 = vpop.xlane.xlu1 %92  ;;  %541 = vmatpush1.bf16.msra.mxu0 %v540_v51  ;;  %563 = vmatpush1.bf16.msra.mxu1 %v540_v51  ;;  %v542_v60 = vpack.c.bf16 %v289_v13, %v287_v55 }
  0xd2   :  { %v102_v52 = vmul.f32 0.0078125, %v77_v47  ;;  %v133_v53 = vmul.f32 %v847_v40, %v847_v40  ;;  %v110_v54 = vmul.f32 0.0078125, %v93_v50  ;;  %v141_v12 = vmul.f32 %v850_v43, %v850_v43 }
  0xd3   :  { %543 = vmatprep.subr.bf16.mxu0 %v542_v60  ;;  %556 = vmatprep.subr.bf16.mxu1 %v542_v60 }
  0xd4   :  { %v857_v58 = vsub.f32 %v780_v14, %v102_v52  ;;  %169 = vadd.xlane.f32.xlu1 %v140_v38  ;;  %155 = vadd.xlane.f32.xlu0 %v133_v53  ;;  %v860_v59 = vsub.f32 %v782_v15, %v110_v54  ;;  %v546_v15 = vpack.c.bf16 %v293_v4, %v291_v3 }
  0xd5   :  { %545 = vmatpush1.bf16.msra.mxu0 %v544_v63  ;;  %564 = vmatpush1.bf16.msra.mxu1 %v544_v63 }
  0xd6   :  { %v134_v2 = vmul.f32 %v857_v58, %v857_v58  ;;  %v142_v14 = vmul.f32 %v860_v59, %v860_v59  ;;  %547 = vmatprep.subr.bf16.mxu0 %v546_v15  ;;  %557 = vmatprep.subr.bf16.mxu1 %v546_v15 }
  0xd8   :  { %171 = vadd.xlane.f32.xlu1 %v141_v12  ;;  %157 = vadd.xlane.f32.xlu0 %v134_v2 }
  0xd9   :  { %549 = vmatpush1.bf16.msra.mxu0 %v548_v17  ;;  %565 = vmatpush1.bf16.msra.mxu1 %v548_v17 }
  0xdc   :  { %173 = vadd.xlane.f32.xlu1 %v142_v14 }
 0x149   :  { %v144_v6 = vpop.xlane.xlu0 %143 }
 0x14a   :  { %v175_v19 = vmul.f32 0.0078125, %v144_v6 }
 0x14c   :  { %v191_v21 = vadd.f32 1e-05, %v175_v19 }
 0x14d   :  { %v160_v22 = vpop.xlane.xlu1 %159  ;;  %v146_v23 = vpop.xlane.xlu0 %145 }
 0x14e   :  { %574 = vrsqrt.f32 %v191_v21  ;;  %v183_v24 = vmul.f32 0.0078125, %v160_v22  ;;  %v176_v25 = vmul.f32 0.0078125, %v146_v23 }
 0x150   :  { %v199_v26 = vadd.f32 1e-05, %v183_v24  ;;  %v192_v27 = vadd.f32 1e-05, %v176_v25 }
 0x151   :  { %v162_v28 = vpop.xlane.xlu1 %161  ;;  %v148_v29 = vpop.xlane.xlu0 %147 }
 0x152   :  { %576 = vrsqrt.f32 %v199_v26  ;;  %v184_v30 = vmul.f32 0.0078125, %v162_v28  ;;  %v177_v31 = vmul.f32 0.0078125, %v148_v29 }
 0x153   :  { %578 = vrsqrt.f32 %v192_v27 }
 0x154   :  { %v200_v32 = vadd.f32 1e-05, %v184_v30  ;;  %v193_v33 = vadd.f32 1e-05, %v177_v31 }
 0x155   :  { %v164_v34 = vpop.xlane.xlu1 %163  ;;  %v150_v35 = vpop.xlane.xlu0 %149 }
 0x156   :  { %580 = vrsqrt.f32 %v200_v32  ;;  %v185_v36 = vmul.f32 0.0078125, %v164_v34  ;;  %v178_v10 = vmul.f32 0.0078125, %v150_v35 }
 0x157   :  { %582 = vrsqrt.f32 %v193_v33 }
 0x158   :  { %v575_v37 = vpop.eup %574  ;;  %v201_v38 = vadd.f32 1e-05, %v185_v36  ;;  %v194_v11 = vadd.f32 1e-05, %v178_v10 }
 0x159   :  { %v166_v44 = vpop.xlane.xlu1 %165  ;;  %v152_v45 = vpop.xlane.xlu0 %151  ;;  %v223_v46 = vmul.f32 %v575_v37, %v787_v41 }
 0x15a   :  { %584 = vrsqrt.f32 %v201_v38  ;;  %v186_v47 = vmul.f32 0.0078125, %v166_v44  ;;  %v179_v50 = vmul.f32 0.0078125, %v152_v45 }
 0x15b   :  { %586 = vrsqrt.f32 %v194_v11  ;;  %v246_v51 = vmul.f32 %v871_v39, %v223_v46 }
 0x15c   :  { %v577_v52 = vpop.eup %576  ;;  %v202_v53 = vadd.f32 1e-05, %v186_v47  ;;  %v195_v54 = vadd.f32 1e-05, %v179_v50 }
 0x15d   :  { %v579_v12 = vpop.eup %578  ;;  %v168_v55 = vpop.xlane.xlu1 %167  ;;  %371 = vmatmul.mubr.f32.vlgmr.msra.gmra.mrb[0].mxu0 %v246_v51  ;;  %v231_v60 = vmul.f32 %v577_v52, %v795_v48 }
 0x15e   :  { %v154_v13 = vpop.xlane.xlu0 %153  ;;  %588 = vrsqrt.f32 %v202_v53  ;;  %v187_v61 = vmul.f32 0.0078125, %v168_v55  ;;  %376 = vmatprep.mubr.f32.mxu0 %v684_v18  ;;  %v224_v41 = vmul.f32 %v579_v12, %v790_v42 }
 0x15f   :  { %v180_v62 = vmul.f32 0.0078125, %v154_v13  ;;  %590 = vrsqrt.f32 %v195_v54  ;;  %v254_v63 = vmul.f32 %v871_v39, %v231_v60 }
 0x160   :  { %v581_v2 = vpop.eup %580  ;;  %v203_v3 = vadd.f32 1e-05, %v187_v61  ;;  %v247_v14 = vmul.f32 %v871_v39, %v224_v41 }
 0x161   :  { %v196_v4 = vadd.f32 1e-05, %v180_v62  ;;  %v583_v15 = vpop.eup %582  ;;  %419 = vmatmul.mubr.f32.vlgmr.msra.gmra.mrb[0].mxu1 %v254_v63  ;;  %v170_v5 = vpop.xlane.xlu1 %169  ;;  %v232_v48 = vmul.f32 %v581_v2, %v798_v49  ;;  %v296_v62 = vlaneseq }
 0x162   :  { %v156_v16 = vpop.xlane.xlu0 %155  ;;  %592 = vrsqrt.f32 %v203_v3  ;;  %v188_v17 = vmul.f32 0.0078125, %v170_v5  ;;  %377 = vmatmul.mubr.f32.gmra.mrb[2].mxu0 %v247_v14  ;;  %424 = vmatprep.mubr.f32.mxu1 %v684_v18  ;;  %v225_v42 = vmul.f32 %v583_v15, %v805_v56 }
 0x163   :  { %v181_v6 = vmul.f32 0.0078125, %v156_v16  ;;  %594 = vrsqrt.f32 %v196_v4  ;;  %382 = vmatprep.mubr.f32.mxu0 %v684_v18  ;;  %v255_v19 = vmul.f32 %v871_v39, %v232_v48  ;;  %v297_v41 = vshrl.u32 %v296_v62, 7 }
 0x164   :  { %v585_v21 = vpop.eup %584  ;;  %v204_v22 = vadd.f32 1e-05, %v188_v17  ;;  %v248_v24 = vmul.f32 %v871_v39, %v225_v42 }
 0x165   :  { %v197_v23 = vadd.f32 1e-05, %v181_v6  ;;  %v587_v25 = vpop.eup %586  ;;  %425 = vmatmul.mubr.f32.gmra.mrb[2].mxu1 %v255_v19  ;;  %v172_v49 = vpop.xlane.xlu1 %171  ;;  %v233_v27 = vmul.f32 %v585_v21, %v808_v57  ;;  %v298_v63 = vsub.s32 0, %v297_v41  ;;  %v302_v2 = vsub.s32 1, %v297_v41 }
 0x166   :  { %v158_v26 = vpop.xlane.xlu0 %157  ;;  %596 = vrsqrt.f32 %v204_v22  ;;  %v189_v28 = vmul.f32 0.0078125, %v172_v49  ;;  %383 = vmatmul.mubr.f32.gmra.mrb[4].mxu0 %v248_v24  ;;  %430 = vmatprep.mubr.f32.mxu1 %v684_v18  ;;  %v226_v29 = vmul.f32 %v587_v25, %v815_v0 }
 0x167   :  { %v182_v56 = vmul.f32 0.0078125, %v158_v26  ;;  %598 = vrsqrt.f32 %v197_v23  ;;  %388 = vmatprep.mubr.f32.mxu0 %v684_v18  ;;  %v256_v30 = vmul.f32 %v871_v39, %v233_v27 }
 0x168   :  { %v589_v31 = vpop.eup %588  ;;  %v205_v32 = vadd.f32 1e-05, %v189_v28  ;;  %v249_v34 = vmul.f32 %v871_v39, %v226_v29 }
 0x169   :  { %v198_v33 = vadd.f32 1e-05, %v182_v56  ;;  %v591_v35 = vpop.eup %590  ;;  %431 = vmatmul.mubr.f32.gmra.mrb[4].mxu1 %v256_v30  ;;  %v174_v57 = vpop.xlane.xlu1 %173  ;;  %v234_v36 = vmul.f32 %v589_v31, %v818_v1 }
 0x16a   :  { %600 = vrsqrt.f32 %v205_v32  ;;  %v190_v10 = vmul.f32 0.0078125, %v174_v57  ;;  %389 = vmatmul.mubr.f32.gmra.mrb[6].mxu0 %v249_v34  ;;  %436 = vmatprep.mubr.f32.mxu1 %v684_v18  ;;  %v227_v0 = vmul.f32 %v591_v35, %v827_v20 }
 0x16b   :  { %602 = vrsqrt.f32 %v198_v33  ;;  %394 = vmatprep.mubr.f32.mxu0 %v684_v18  ;;  %v257_v37 = vmul.f32 %v871_v39, %v234_v36 }
 0x16c   :  { %v593_v38 = vpop.eup %592  ;;  %v206_v11 = vadd.f32 1e-05, %v190_v10  ;;  %v250_v44 = vmul.f32 %v871_v39, %v227_v0 }
 0x16d   :  { %v595_v45 = vpop.eup %594  ;;  %437 = vmatmul.mubr.f32.gmra.mrb[6].mxu1 %v257_v37  ;;  %v235_v1 = vmul.f32 %v593_v38, %v830_v7 }
 0x16e   :  { %604 = vrsqrt.f32 %v206_v11  ;;  %395 = vmatmul.mubr.f32.gmra.mrb[8].mxu0 %v250_v44  ;;  %442 = vmatprep.mubr.f32.mxu1 %v684_v18  ;;  %v228_v46 = vmul.f32 %v595_v45, %v835_v8 }
 0x16f   :  { %400 = vmatprep.mubr.f32.mxu0 %v684_v18  ;;  %v258_v20 = vmul.f32 %v871_v39, %v235_v1 }
 0x170   :  { %v597_v47 = vpop.eup %596  ;;  %v251_v50 = vmul.f32 %v871_v39, %v228_v46 }
 0x171   :  { %v599_v51 = vpop.eup %598  ;;  %443 = vmatmul.mubr.f32.gmra.mrb[8].mxu1 %v258_v20  ;;  %v236_v52 = vmul.f32 %v597_v47, %v838_v9 }
 0x172   :  { %401 = vmatmul.mubr.f32.gmra.mrb[10].mxu0 %v251_v50  ;;  %448 = vmatprep.mubr.f32.mxu1 %v684_v18  ;;  %v229_v7 = vmul.f32 %v599_v51, %v847_v40 }
 0x173   :  { %406 = vmatprep.mubr.f32.mxu0 %v684_v18  ;;  %v259_v8 = vmul.f32 %v871_v39, %v236_v52 }
 0x174   :  { %v601_v53 = vpop.eup %600  ;;  %v252_v54 = vmul.f32 %v871_v39, %v229_v7 }
 0x175   :  { %v603_v12 = vpop.eup %602  ;;  %449 = vmatmul.mubr.f32.gmra.mrb[10].mxu1 %v259_v8  ;;  %v237_v55 = vmul.f32 %v601_v53, %v850_v43 }
 0x176   :  { %407 = vmatmul.mubr.f32.gmra.mrb[12].mxu0 %v252_v54  ;;  %454 = vmatprep.mubr.f32.mxu1 %v684_v18  ;;  %v230_v9 = vmul.f32 %v603_v12, %v857_v58  ;;  %v294_v58 = vld [vmem:[%s976_s3] sm:$0x3]  ;;  %s685_s3 = smov [#allocation7]  }
 0x177   :  { %412 = vmatprep.mubr.f32.mxu0 %v684_v18  ;;  %v260_v40 = vmul.f32 %v871_v39, %v237_v55  ;;  %v922_v3 = vrot.slane %v294_v58, %v298_v63  ;;  %v924_v4 = vrot.slane %v294_v58, %v302_v2  ;;  %s504_s18 = sshll.u32 %s685_s3, 4  ;;  %s505_s18 = int_to_ptr.vmem [resolvable:$true] %s504_s18 }
 0x178   :  { %v605_v13 = vpop.eup %604  ;;  %v253_v60 = vmul.f32 %v871_v39, %v230_v9  ;;  %s650_s19 = scalar_lea.vmem %s505_s18, 4096  ;;  %p655_p3 = scmp.lt.s32.totalorder %s505_s18, %s505_s18 }
 0x179   :  { %455 = vmatmul.mubr.f32.gmra.mrb[12].mxu1 %v260_v40  ;;  %v238_v61 = vmul.f32 %v605_v13, %v860_v59  ;;  %p651_p2 = scmp.ne.s32.totalorder %s505_s18, %s650_s19  ;;  %p656_p4 = scmp.lt.s32.totalorder %s650_s19, %s650_s19 }
 0x17a   :  { %413 = vmatmul.mubr.f32.gmra.mrb[14].mxu0 %v253_v60  ;;  %460 = vmatprep.mubr.f32.mxu1 %v684_v18 }
 0x17b   :  { %v261_v43 = vmul.f32 %v871_v39, %v238_v61  ;;  %p657_p5 = por %p656_p4, %p655_p3 }
 0x17d   :  { %461 = vmatmul.mubr.f32.gmra.mrb[14].mxu1 %v261_v43  ;;  %p658_p6 = pnand %p657_p5, %p651_p2 }
 0x230   :  { %v372_v14 = vpop.f32.mrb[0].mxu0 }
 0x231   :  { %v373_v59 = vadd.f32 %v372_v14, %v922_v3  ;;  %v374_v15 = vpop.f32.mrb[1].mxu0 }
 0x232   :  { %v375_v18 = vadd.f32 %v374_v15, %v924_v4 }
 0x233   :  { %467 = vst [vmem:[#allocation7] sm:$0xff] %v373_v59 }
 0x234   :  { %468 = vst [vmem:[#allocation7 + $0x8] sm:$0xff] %v375_v18  ;;  %v420_v39 = vpop.f32.mrb[0].mxu1 }
 0x235   :  { %v378_v5 = vpop.f32.mrb[2].mxu0  ;;  %v421_v16 = vadd.f32 %v420_v39, %v922_v3  ;;  %v422_v48 = vpop.f32.mrb[1].mxu1 }
 0x236   :  { %v379_v17 = vadd.f32 %v378_v5, %v922_v3  ;;  %v380_v6 = vpop.f32.mrb[3].mxu0  ;;  %v423_v42 = vadd.f32 %v422_v48, %v924_v4 }
 0x237   :  { %483 = vst [vmem:[#allocation7 + $0x80] sm:$0xff] %v421_v16  ;;  %v381_v19 = vadd.f32 %v380_v6, %v924_v4 }
 0x238   :  { %469 = vst [vmem:[#allocation7 + $0x10] sm:$0xff] %v379_v17  ;;  %484 = vst [vmem:[#allocation7 + $0x88] sm:$0xff] %v423_v42  ;;  %v426_v21 = vpop.f32.mrb[2].mxu1 }
 0x239   :  { %470 = vst [vmem:[#allocation7 + $0x18] sm:$0xff] %v381_v19  ;;  %v384_v22 = vpop.f32.mrb[4].mxu0  ;;  %v427_v23 = vadd.f32 %v426_v21, %v922_v3  ;;  %v428_v24 = vpop.f32.mrb[3].mxu1 }
 0x23a   :  { %v385_v25 = vadd.f32 %v384_v22, %v922_v3  ;;  %v386_v49 = vpop.f32.mrb[5].mxu0  ;;  %v429_v26 = vadd.f32 %v428_v24, %v924_v4 }
 0x23b   :  { %485 = vst [vmem:[#allocation7 + $0x90] sm:$0xff] %v427_v23  ;;  %v387_v27 = vadd.f32 %v386_v49, %v924_v4 }
 0x23c   :  { %471 = vst [vmem:[#allocation7 + $0x20] sm:$0xff] %v385_v25  ;;  %486 = vst [vmem:[#allocation7 + $0x98] sm:$0xff] %v429_v26  ;;  %v432_v28 = vpop.f32.mrb[4].mxu1 }
 0x23d   :  { %472 = vst [vmem:[#allocation7 + $0x28] sm:$0xff] %v387_v27  ;;  %v390_v56 = vpop.f32.mrb[6].mxu0  ;;  %v433_v29 = vadd.f32 %v432_v28, %v922_v3  ;;  %v434_v30 = vpop.f32.mrb[5].mxu1 }
 0x23e   :  { %v391_v31 = vadd.f32 %v390_v56, %v922_v3  ;;  %v392_v32 = vpop.f32.mrb[7].mxu0  ;;  %v435_v33 = vadd.f32 %v434_v30, %v924_v4 }
 0x23f   :  { %487 = vst [vmem:[#allocation7 + $0xa0] sm:$0xff] %v433_v29  ;;  %v393_v34 = vadd.f32 %v392_v32, %v924_v4 }
 0x240   :  { %473 = vst [vmem:[#allocation7 + $0x30] sm:$0xff] %v391_v31  ;;  %488 = vst [vmem:[#allocation7 + $0xa8] sm:$0xff] %v435_v33  ;;  %v438_v35 = vpop.f32.mrb[6].mxu1 }
 0x241   :  { %474 = vst [vmem:[#allocation7 + $0x38] sm:$0xff] %v393_v34  ;;  %v396_v57 = vpop.f32.mrb[8].mxu0  ;;  %v439_v36 = vadd.f32 %v438_v35, %v922_v3  ;;  %v440_v10 = vpop.f32.mrb[7].mxu1 }
 0x242   :  { %v397_v0 = vadd.f32 %v396_v57, %v922_v3  ;;  %v398_v37 = vpop.f32.mrb[9].mxu0  ;;  %v441_v38 = vadd.f32 %v440_v10, %v924_v4 }
 0x243   :  { %489 = vst [vmem:[#allocation7 + $0xb0] sm:$0xff] %v439_v36  ;;  %v399_v11 = vadd.f32 %v398_v37, %v924_v4 }
 0x244   :  { %475 = vst [vmem:[#allocation7 + $0x40] sm:$0xff] %v397_v0  ;;  %490 = vst [vmem:[#allocation7 + $0xb8] sm:$0xff] %v441_v38  ;;  %v444_v44 = vpop.f32.mrb[8].mxu1 }
 0x245   :  { %476 = vst [vmem:[#allocation7 + $0x48] sm:$0xff] %v399_v11  ;;  %v402_v45 = vpop.f32.mrb[10].mxu0  ;;  %v445_v1 = vadd.f32 %v444_v44, %v922_v3  ;;  %v446_v46 = vpop.f32.mrb[9].mxu1 }
 0x246   :  { %v403_v20 = vadd.f32 %v402_v45, %v922_v3  ;;  %v404_v47 = vpop.f32.mrb[11].mxu0  ;;  %v447_v50 = vadd.f32 %v446_v46, %v924_v4 }
 0x247   :  { %491 = vst [vmem:[#allocation7 + $0xc0] sm:$0xff] %v445_v1  ;;  %v405_v51 = vadd.f32 %v404_v47, %v924_v4 }
 0x248   :  { %477 = vst [vmem:[#allocation7 + $0x50] sm:$0xff] %v403_v20  ;;  %492 = vst [vmem:[#allocation7 + $0xc8] sm:$0xff] %v447_v50  ;;  %v450_v52 = vpop.f32.mrb[10].mxu1 }
 0x249   :  { %478 = vst [vmem:[#allocation7 + $0x58] sm:$0xff] %v405_v51  ;;  %v408_v7 = vpop.f32.mrb[12].mxu0  ;;  %v451_v8 = vadd.f32 %v450_v52, %v922_v3  ;;  %v452_v53 = vpop.f32.mrb[11].mxu1 }
 0x24a   :  { %v409_v54 = vadd.f32 %v408_v7, %v922_v3  ;;  %v410_v12 = vpop.f32.mrb[13].mxu0  ;;  %v453_v55 = vadd.f32 %v452_v53, %v924_v4 }
 0x24b   :  { %493 = vst [vmem:[#allocation7 + $0xd0] sm:$0xff] %v451_v8  ;;  %v411_v9 = vadd.f32 %v410_v12, %v924_v4 }
 0x24c   :  { %479 = vst [vmem:[#allocation7 + $0x60] sm:$0xff] %v409_v54  ;;  %494 = vst [vmem:[#allocation7 + $0xd8] sm:$0xff] %v453_v55  ;;  %v456_v40 = vpop.f32.mrb[12].mxu1 }
 0x24d   :  { %480 = vst [vmem:[#allocation7 + $0x68] sm:$0xff] %v411_v9  ;;  %v414_v13 = vpop.f32.mrb[14].mxu0  ;;  %v457_v60 = vadd.f32 %v456_v40, %v922_v3  ;;  %v458_v61 = vpop.f32.mrb[13].mxu1 }
 0x24e   :  { %v415_v43 = vadd.f32 %v414_v13, %v922_v3  ;;  %v416_v62 = vpop.f32.mrb[15].mxu0  ;;  %v459_v41 = vadd.f32 %v458_v61, %v924_v4 }
 0x24f   :  { %495 = vst [vmem:[#allocation7 + $0xe0] sm:$0xff] %v457_v60  ;;  %v417_v63 = vadd.f32 %v416_v62, %v924_v4 }
 0x250   :  { %481 = vst [vmem:[#allocation7 + $0x70] sm:$0xff] %v415_v43  ;;  %496 = vst [vmem:[#allocation7 + $0xe8] sm:$0xff] %v459_v41  ;;  %v462_v58 = vpop.f32.mrb[14].mxu1 }
 0x251   :  { %482 = vst [vmem:[#allocation7 + $0x78] sm:$0xff] %v417_v63  ;;  %v463_v2 = vadd.f32 %v462_v58, %v922_v3  ;;  %v464_v14 = vpop.f32.mrb[15].mxu1 }
 0x252   :  { %v465_v59 = vadd.f32 %v464_v14, %v924_v4 }
 0x253   :  { %497 = vst [vmem:[#allocation7 + $0xf0] sm:$0xff] %v463_v2 }
 0x254   :  { %498 = vst [vmem:[#allocation7 + $0xf8] sm:$0xff] %v465_v59 }
 0x255   :  { %661 = shalt.err (!%p658_p6)
}
 0x256   :  { %s662_s22 = scalar_lea.hbm %s977_s4, 4096 }
 0x257   :  { %p663_p7 = scmp.ne.s32.totalorder %s977_s4, %s662_s22  ;;  %p666_p8 = scmp.lt.u32.totalorder %s662_s22, %s977_s4 }
 0x259   :  { %p668_p9 = pnand %p666_p8, %p663_p7 }
 0x25b   :  { %671 = shalt.err (!%p668_p9)
}
 0x25c   :  { %510 = dma.vmem_to_hbm [thread:$0]  %s505_s18, 4096, %s977_s4, [#allocation4], %s682_s0, %s682_s0, %s683_s13  }
 0x25d   :  { %676 = dma.done.wait [#allocation4], 4096  }
 0x25e   :  { %677 = vsyncadd [#allocation4], 4294963200 }
 0x25f   :  { %514 = vsyncpa [#allocation3], 1 }
 0x260   :  { %515 = vsyncpa [#allocation6], 1 }
 0x261   :  { %516 = vsyncpa [#allocation4], 1 }

</bundles_post_ra>
